<compile_context>
chip_gen: v6e
topology: v6e:2x2x1
jax: 0.10.0
libtpu: 0.0.40
codegen_flags: <defaults>
</compile_context>

<pallas_src>
import jax
import jax.numpy as jnp
from jax import lax
from jax.experimental import pallas as pl
from jax.experimental.pallas import tpu as pltpu

EPS = 1e-5  # InstanceNorm2d default eps


def _round_up(x, m):
    return (x + m - 1) // m * m


def _make_kernel(Cin_pad, Cout, H, W, Lk):
    Wp = W + 2
    HWp = H * Wp
    inv_n = 1.0 / float(4 * H * W)   # biased variance over OH*OW = 4*H*W

    def kernel(x_ref, w_ref, alpha_ref, out_ref):
        # x_ref:     (1, Cin_pad, Pin)    bf16   padded + flattened input
        # w_ref:     (4*Cout, 9*Cin_pad)  bf16   fused per-parity weights
        # alpha_ref: (1,)                 f32    PReLU slope (SMEM)
        # out_ref:   (1, 4*Cout, Lk)      bf16   parity-major lane-dense slab
        xf = x_ref[0]                                            # (Cin_pad, Pin)

        # 9 deduplicated taps, each a single static lane slice (no HBM im2col,
        # no structural zeros). Cin_pad is a multiple of 16, so concatenating
        # along sublanes is plain tile copies.
        taps = [xf[:, u * Wp + v: u * Wp + v + Lk]
                for u in range(3) for v in range(3)]
        rhs = jnp.concatenate(taps, axis=0)                      # (9*Cin_pad, Lk)

        # All 4 output parities in ONE underfilled-MXU matmul, f32 accumulation.
        y = jnp.dot(w_ref[...], rhs,
                    preferred_element_type=jnp.float32)          # (4*Cout, Lk)
        y3 = y.reshape(4, Cout, Lk)                              # (parity, Cout, Lk)

        # Valid-column mask built in-kernel (junk columns: b >= W or a >= H).
        col = lax.broadcasted_iota(jnp.int32, (1, 1, Lk), 2)
        maskf = jnp.logical_and(col % Wp < W, col < HWp).astype(jnp.float32)

        # InstanceNorm2d(affine=False): per-channel stats over all 4 parities,
        # two-pass variance (no cancellation).
        mean = jnp.sum(jnp.sum(y3 * maskf, axis=2, keepdims=True),
                       axis=0, keepdims=True) * inv_n            # (1, Cout, 1)
        diff = y3 - mean
        dm = diff * maskf
        var = jnp.sum(jnp.sum(dm * dm, axis=2, keepdims=True),
                      axis=0, keepdims=True) * inv_n
        yn = diff * lax.rsqrt(var + EPS)

        # PReLU.
        alpha = alpha_ref[0]
        out = jnp.where(yn >= 0.0, yn, alpha * yn)
        out_ref[0] = out.reshape(4 * Cout, Lk).astype(out_ref.dtype)

    return kernel


def deconv_block_forward(x, weight, bias, alpha, *, stride=2, padding=1):
    """x: (N, Cin, H, W), weight: (Cin, Cout, 4, 4) [ConvTranspose2d layout],
    bias: (Cout,) (ignored: exactly cancelled by InstanceNorm), alpha: scalar."""
    if stride != 2 or padding != 1 or weight.shape[2] != 4 or weight.shape[3] != 4:
        raise NotImplementedError("kernel specialised for kernel_size=4, stride=2, padding=1")
    del bias  # InstanceNorm2d(affine=False) removes any per-channel constant.

    N, Cin, H, W = x.shape
    Cout = weight.shape[1]
    Hp, Wp = H + 2, W + 2
    Lk = _round_up(H * Wp, 128)              # lane-dense output slab length
    Pin = _round_up(2 * Wp + 2 + Lk, 128)    # input lane length (covers all 9 taps)
    Cin_pad = _round_up(Cin, 16)             # bf16 sublane pack

    # ---- glue: pad + flatten the input (only ~1x the input is streamed) -----
    x_p = jnp.pad(x, ((0, 0), (0, 0), (1, 1), (1, 1)))
    x_flat = x_p.reshape(N, Cin, Hp * Wp)
    x_flat = jnp.pad(x_flat, ((0, 0), (0, Cin_pad - Cin), (0, Pin - Hp * Wp)))
    x_flat = x_flat.astype(jnp.bfloat16)

    # ---- fused per-parity weights --------------------------------------------
    # wf[ci, co, dh, r, dw, s] = weight[ci, co, 3-(r+2dh), 3-(s+2dw)]
    wf = weight[:, :, ::-1, ::-1].reshape(Cin, Cout, 2, 2, 2, 2)
    w_fused = jnp.zeros((4, Cout, 9, Cin_pad), jnp.float32)
    for r in range(2):
        for s in range(2):
            for dh in range(2):
                for dw in range(2):
                    p = 2 * r + s
                    t9 = (r + dh) * 3 + (s + dw)     # shared-tap index
                    w_fused = w_fused.at[p, :, t9, :Cin].set(wf[:, :, dh, r, dw, s].T)
    w_fused = w_fused.reshape(4 * Cout, 9 * Cin_pad).astype(jnp.bfloat16)

    alpha_arr = jnp.asarray(alpha, jnp.float32).reshape(1)

    kernel = _make_kernel(Cin_pad, Cout, H, W, Lk)

    out_par = pl.pallas_call(
        kernel,
        out_shape=jax.ShapeDtypeStruct((N, 4 * Cout, Lk), jnp.bfloat16),
        grid_spec=pltpu.PrefetchScalarGridSpec(
            num_scalar_prefetch=0,
            grid=(N,),
            in_specs=[
                pl.BlockSpec((1, Cin_pad, Pin), lambda n: (n, 0, 0)),
                pl.BlockSpec((4 * Cout, 9 * Cin_pad), lambda n: (0, 0)),
                pl.BlockSpec(memory_space=pltpu.MemorySpace.SMEM),   # alpha scalar
            ],
            out_specs=pl.BlockSpec((1, 4 * Cout, Lk), lambda n: (n, 0, 0)),
        ),
        compiler_params=pltpu.CompilerParams(
            dimension_semantics=("parallel",),          # N>=2 -> both v7x cores busy
            vmem_limit_bytes=48 * 1024 * 1024,          # stay within v7x's 64 MiB
        ),
    )(x_flat, w_fused, alpha_arr)

    # ---- glue: strip junk columns + interleave the 4 parities -> NCHW -------
    y = out_par[..., :H * Wp].reshape(N, 2, 2, Cout, H, Wp)[..., :W]
    out = y.transpose(0, 3, 4, 1, 5, 2).reshape(N, Cout, 2 * H, 2 * W)
    # Module returns float32; activations passed through a bf16 bottleneck.
    return out.astype(jnp.float32)


def _reference(x, weight, bias, alpha, *, stride=2, padding=1):
    """Pure-JAX reference with PyTorch semantics."""
    Cin, Cout, K, _ = weight.shape
    w_conv = jnp.flip(weight, axis=(2, 3)).transpose(1, 0, 2, 3)  # (Cout, Cin, K, K)
    pad = K - 1 - padding
    y = lax.conv_general_dilated(
        x, w_conv, window_strides=(1, 1),
        padding=[(pad, pad), (pad, pad)],
        lhs_dilation=(stride, stride),
        dimension_numbers=("NCHW", "OIHW", "NCHW"))
    y = y + bias.reshape(1, Cout, 1, 1)
    mean = y.mean(axis=(2, 3), keepdims=True)
    var = ((y - mean) ** 2).mean(axis=(2, 3), keepdims=True)
    yn = (y - mean) * lax.rsqrt(var + EPS)
    return jnp.where(yn >= 0, yn, alpha * yn)


if __name__ == "__main__":
    key = jax.random.PRNGKey(0)
    k1, k2, k3 = jax.random.split(key, 3)

    N, Cin, H, W = 2, 4, 16, 16
    Cout, K, stride, padding = 8, 4, 2, 1

    x = jax.random.normal(k1, (N, Cin, H, W), jnp.float32)
    bound = 1.0 / (Cin * K * K) ** 0.5
    weight = jax.random.uniform(k2, (Cin, Cout, K, K), jnp.float32, -bound, bound)
    bias = jax.random.uniform(k3, (Cout,), jnp.float32, -bound, bound)
    alpha = 0.25  # PReLU default init

    out = deconv_block_forward(x, weight, bias, alpha, stride=stride, padding=padding)
    out = jax.block_until_ready(out)
    assert out.shape == (N, Cout, 2 * H, 2 * W), out.shape

    # 1) vs exact f32 PyTorch-semantics reference (loose tol: bf16 MXU operands,
    #    bf16 output writeback, f32 accumulation/normalisation).
    ref = _reference(x, weight, bias, alpha, stride=stride, padding=padding)
    err = float(jnp.max(jnp.abs(out - ref)))
    assert jnp.allclose(out, ref, atol=5e-2, rtol=5e-2), err

    # 2) vs the same math on bf16-rounded inputs: validates the fused parity
    #    decomposition, masking and normalisation structure.  Tolerance reflects
    #    the bf16 output writeback (half-ulp ~8e-3 at |y|~3); a structural bug
    #    would produce O(1) errors.
    xq = x.astype(jnp.bfloat16).astype(jnp.float32)
    wq = weight.astype(jnp.bfloat16).astype(jnp.float32)
    ref_q = _reference(xq, wq, bias, alpha, stride=stride, padding=padding)
    err_q = float(jnp.max(jnp.abs(out - ref_q)))
    assert jnp.allclose(out, ref_q, atol=2e-2, rtol=2e-2), err_q

    print("KERNEL_OK")
</pallas_src>

<mosaic_0001>
module attributes {stable_mosaic.version = 11 : i64} {
  func.func @kernel(%arg0: i32, %arg1: memref<1x16x512xbf16, #tpu.memory_space<vmem>>, %arg2: memref<32x144xbf16, #tpu.memory_space<vmem>>, %arg3: memref<1xf32, #tpu.memory_space<smem>>, %arg4: memref<1x32x384xbf16, #tpu.memory_space<vmem>>) attributes {dimension_semantics = [#tpu.dimension_semantics<parallel>], iteration_bounds = array<i64: 2>, scalar_prefetch = 0 : i64, scratch_operands = 0 : i64, tpu.core_type = #tpu.core_type<tc>, window_params = [{transform_indices = @transform_0, window_bounds = array<i64: 1, 16, 512>}, {pipeline_mode = #tpu.pipeline_mode<synchronous>, transform_indices = @transform_1, window_bounds = array<i64: 32, 144>}, {transform_indices = @transform_2, window_bounds = array<i64: 1>}, {transform_indices = @transform_3, window_bounds = array<i64: 1, 32, 384>}]} {
    %c0 = arith.constant 0 : index
    %c0_0 = arith.constant 0 : index
    %c0_1 = arith.constant 0 : index
    %0 = vector.load %arg1[%c0, %c0_0, %c0_1] : memref<1x16x512xbf16, #tpu.memory_space<vmem>>, vector<1x16x512xbf16>
    %1 = vector.shape_cast %0 : vector<1x16x512xbf16> to vector<16x512xbf16>
    %2 = vector.extract_strided_slice %1 {offsets = [0, 0], sizes = [16, 384], strides = [1, 1]} : vector<16x512xbf16> to vector<16x384xbf16>
    %3 = vector.extract_strided_slice %1 {offsets = [0, 1], sizes = [16, 384], strides = [1, 1]} : vector<16x512xbf16> to vector<16x384xbf16>
    %4 = vector.extract_strided_slice %1 {offsets = [0, 2], sizes = [16, 384], strides = [1, 1]} : vector<16x512xbf16> to vector<16x384xbf16>
    %5 = vector.extract_strided_slice %1 {offsets = [0, 18], sizes = [16, 384], strides = [1, 1]} : vector<16x512xbf16> to vector<16x384xbf16>
    %6 = vector.extract_strided_slice %1 {offsets = [0, 19], sizes = [16, 384], strides = [1, 1]} : vector<16x512xbf16> to vector<16x384xbf16>
    %7 = vector.extract_strided_slice %1 {offsets = [0, 20], sizes = [16, 384], strides = [1, 1]} : vector<16x512xbf16> to vector<16x384xbf16>
    %8 = vector.extract_strided_slice %1 {offsets = [0, 36], sizes = [16, 384], strides = [1, 1]} : vector<16x512xbf16> to vector<16x384xbf16>
    %9 = vector.extract_strided_slice %1 {offsets = [0, 37], sizes = [16, 384], strides = [1, 1]} : vector<16x512xbf16> to vector<16x384xbf16>
    %10 = vector.extract_strided_slice %1 {offsets = [0, 38], sizes = [16, 384], strides = [1, 1]} : vector<16x512xbf16> to vector<16x384xbf16>
    %11 = tpu.concatenate %2, %3, %4, %5, %6, %7, %8, %9, %10 in 0 : vector<16x384xbf16>, vector<16x384xbf16>, vector<16x384xbf16>, vector<16x384xbf16>, vector<16x384xbf16>, vector<16x384xbf16>, vector<16x384xbf16>, vector<16x384xbf16>, vector<16x384xbf16> -> vector<144x384xbf16>
    %c0_2 = arith.constant 0 : index
    %c0_3 = arith.constant 0 : index
    %12 = vector.load %arg2[%c0_2, %c0_3] : memref<32x144xbf16, #tpu.memory_space<vmem>>, vector<32x144xbf16>
    %cst = arith.constant dense<0.000000e+00> : vector<32x384xf32>
    %13 = tpu.matmul %12, %11, %cst {dimension_numbers = #tpu.dot_dimension_numbers<[1], [0], [0], [1], [0, 0, 1, 1], [], []>} : vector<32x144xbf16>, vector<144x384xbf16>, vector<32x384xf32> -> vector<32x384xf32>
    %14 = vector.shape_cast %13 : vector<32x384xf32> to vector<4x8x384xf32>
    %15 = tpu.iota {dimensions = array<i32: 2>} : vector<1x1x384xi32>
    %c18_i32 = arith.constant 18 : i32
    %c0_i32 = arith.constant 0 : i32
    %16 = arith.cmpi eq, %c18_i32, %c0_i32 : i32
    %c1_i32 = arith.constant 1 : i32
    %17 = arith.select %16, %c1_i32, %c18_i32 : i32
    %18 = vector.broadcast %17 : i32 to vector<1x1x384xi32>
    %19 = arith.remsi %15, %18 : vector<1x1x384xi32>
    %c0_i32_4 = arith.constant 0 : i32
    %20 = vector.broadcast %c0_i32_4 : i32 to vector<1x1x384xi32>
    %21 = arith.cmpi ne, %19, %20 : vector<1x1x384xi32>
    %c0_i32_5 = arith.constant 0 : i32
    %22 = vector.broadcast %c0_i32_5 : i32 to vector<1x1x384xi32>
    %23 = arith.cmpi slt, %19, %22 : vector<1x1x384xi32>
    %c0_i32_6 = arith.constant 0 : i32
    %24 = arith.cmpi slt, %17, %c0_i32_6 : i32
    %25 = vector.broadcast %24 : i1 to vector<1x1x384xi1>
    %26 = vector.broadcast %25 : vector<1x1x384xi1> to vector<1x1x384xi1>
    %27 = arith.xori %23, %26 : vector<1x1x384xi1>
    %28 = arith.andi %27, %21 : vector<1x1x384xi1>
    %29 = vector.broadcast %17 : i32 to vector<1x1x384xi32>
    %30 = arith.addi %19, %29 : vector<1x1x384xi32>
    %31 = arith.select %28, %30, %19 : vector<1x1x384xi1>, vector<1x1x384xi32>
    %c16_i32 = arith.constant 16 : i32
    %32 = vector.broadcast %c16_i32 : i32 to vector<1x1x384xi32>
    %33 = arith.cmpi slt, %31, %32 : vector<1x1x384xi32>
    %c288_i32 = arith.constant 288 : i32
    %34 = vector.broadcast %c288_i32 : i32 to vector<1x1x384xi32>
    %35 = arith.cmpi slt, %15, %34 : vector<1x1x384xi32>
    %36 = arith.andi %33, %35 : vector<1x1x384xi1>
    %37 = arith.extui %36 : vector<1x1x384xi1> to vector<1x1x384xi32>
    %38 = arith.sitofp %37 : vector<1x1x384xi32> to vector<1x1x384xf32>
    %39 = vector.broadcast %38 : vector<1x1x384xf32> to vector<4x8x384xf32>
    %40 = arith.mulf %14, %39 : vector<4x8x384xf32>
    %cst_7 = arith.constant dense<0.000000e+00> : vector<4x8xf32>
    %41 = vector.multi_reduction <add>, %40, %cst_7 [2] : vector<4x8x384xf32> to vector<4x8xf32>
    %42 = vector.shape_cast %41 : vector<4x8xf32> to vector<4x8x1xf32>
    %cst_8 = arith.constant dense<0.000000e+00> : vector<8x1xf32>
    %43 = vector.multi_reduction <add>, %42, %cst_8 [0] : vector<4x8x1xf32> to vector<8x1xf32>
    %44 = vector.shape_cast %43 : vector<8x1xf32> to vector<1x8x1xf32>
    %cst_9 = arith.constant 9.765625E-4 : f32
    %45 = vector.broadcast %cst_9 : f32 to vector<1x8x1xf32>
    %46 = arith.mulf %44, %45 : vector<1x8x1xf32>
    %47 = vector.broadcast %46 : vector<1x8x1xf32> to vector<4x8x384xf32>
    %48 = arith.subf %14, %47 : vector<4x8x384xf32>
    %49 = vector.broadcast %38 : vector<1x1x384xf32> to vector<4x8x384xf32>
    %50 = arith.mulf %48, %49 : vector<4x8x384xf32>
    %51 = arith.mulf %50, %50 : vector<4x8x384xf32>
    %cst_10 = arith.constant dense<0.000000e+00> : vector<4x8xf32>
    %52 = vector.multi_reduction <add>, %51, %cst_10 [2] : vector<4x8x384xf32> to vector<4x8xf32>
    %53 = vector.shape_cast %52 : vector<4x8xf32> to vector<4x8x1xf32>
    %cst_11 = arith.constant dense<0.000000e+00> : vector<8x1xf32>
    %54 = vector.multi_reduction <add>, %53, %cst_11 [0] : vector<4x8x1xf32> to vector<8x1xf32>
    %55 = vector.shape_cast %54 : vector<8x1xf32> to vector<1x8x1xf32>
    %cst_12 = arith.constant 9.765625E-4 : f32
    %56 = vector.broadcast %cst_12 : f32 to vector<1x8x1xf32>
    %57 = arith.mulf %55, %56 : vector<1x8x1xf32>
    %cst_13 = arith.constant 9.99999974E-6 : f32
    %58 = vector.broadcast %cst_13 : f32 to vector<1x8x1xf32>
    %59 = arith.addf %57, %58 : vector<1x8x1xf32>
    %60 = math.rsqrt %59 : vector<1x8x1xf32>
    %61 = vector.broadcast %60 : vector<1x8x1xf32> to vector<4x8x384xf32>
    %62 = arith.mulf %48, %61 : vector<4x8x384xf32>
    %c0_14 = arith.constant 0 : index
    %63 = memref.load %arg3[%c0_14] : memref<1xf32, #tpu.memory_space<smem>>
    %cst_15 = arith.constant 0.000000e+00 : f32
    %64 = vector.broadcast %cst_15 : f32 to vector<4x8x384xf32>
    %65 = arith.cmpf oge, %62, %64 : vector<4x8x384xf32>
    %66 = vector.broadcast %63 : f32 to vector<4x8x384xf32>
    %67 = arith.mulf %66, %62 : vector<4x8x384xf32>
    %68 = arith.select %65, %62, %67 : vector<4x8x384xi1>, vector<4x8x384xf32>
    %69 = vector.shape_cast %68 : vector<4x8x384xf32> to vector<32x384xf32>
    %70 = arith.truncf %69 : vector<32x384xf32> to vector<32x384xbf16>
    %c0_16 = arith.constant 0 : index
    %c0_17 = arith.constant 0 : index
    %c0_18 = arith.constant 0 : index
    %71 = vector.load %arg4[%c0_16, %c0_17, %c0_18] : memref<1x32x384xbf16, #tpu.memory_space<vmem>>, vector<1x32x384xbf16>
    %72 = vector.shape_cast %71 : vector<1x32x384xbf16> to vector<32x384xbf16>
    %73 = vector.shape_cast %70 : vector<32x384xbf16> to vector<1x32x384xbf16>
    tpu.vector_store %arg4[%c0_16, %c0_17, %c0_18], %73 {strides = array<i32>} : memref<1x32x384xbf16, #tpu.memory_space<vmem>>, vector<1x32x384xbf16>,
    return
  }
  func.func @transform_0(%arg0: i32) -> (i32, i32, i32) {
    %c0_i32 = arith.constant 0 : i32
    %c0_i32_0 = arith.constant 0 : i32
    %c0_i32_1 = arith.constant 0 : i32
    return %arg0, %c0_i32, %c0_i32_0 : i32, i32, i32
  }
  func.func @transform_1(%arg0: i32) -> (i32, i32) {
    %c0_i32 = arith.constant 0 : i32
    %c0_i32_0 = arith.constant 0 : i32
    %c0_i32_1 = arith.constant 0 : i32
    return %c0_i32, %c0_i32_0 : i32, i32
  }
  func.func @transform_2(%arg0: i32) -> i32 {
    %c0_i32 = arith.constant 0 : i32
    %c0_i32_0 = arith.constant 0 : i32
    return %c0_i32 : i32
  }
  func.func @transform_3(%arg0: i32) -> (i32, i32, i32) {
    %c0_i32 = arith.constant 0 : i32
    %c0_i32_0 = arith.constant 0 : i32
    %c0_i32_1 = arith.constant 0 : i32
    return %arg0, %c0_i32, %c0_i32_0 : i32, i32, i32
  }
}

</mosaic_0001>

<bundles_post_ra>
// kernel: tpu_custom_call.1
= control target key start
LH: loop header
LB: loop body
LE: loop exit
PB: predicated region body
PF: predicated region fallthrough
CT: control target
= control target key end

     0   :  { %s1462_s0 = inlined_call_operand.hbm [shape: bf16[2,16,512], index: 0, kind: input, shape index: {}]   ;;  %s1463_s1 = inlined_call_operand.hbm [shape: bf16[32,144], index: 1, kind: input, shape index: {}]   ;;  %s1464_s2 = inlined_call_operand.<no memory space> [shape: f32[1], index: 2, kind: input, shape index: {}]   ;;  %s1465_s3 = inlined_call_operand.hbm [shape: bf16[2,32,384], index: 3, kind: output, shape index: {}]  }
   0x1   :  { %8 = sst [smem:[#allocation2]] %s1464_s2 }
   0x2   :  { %9 = vsyncpa [#allocation4], 0 }
   0x3   :  { %11 = vsyncpa [#allocation4 + $0x1], 0 }
   0x4   :  { %12 = vsyncpa [#allocation7], 0 }
   0x5   :  { %13 = vsyncpa [#allocation5], 0 }
   0x6   :  { %15 = vsyncpa [#allocation5 + $0x1], 0  ;;  %s1138_s14 = smov 0   ;;  %s1140_s15 = smov 0  }
   0x7   :  { %s1142_s16 = smov 0   ;;  %s1144_s17 = smov 0  }
   0x8 LB: > { %s1159_s2 = sadd.s32 4294967295, %s1094_s17   ;;  %s832_s18 = sadd.s32 4294967294, %s1094_s17   ;;  %s1094_s17 = sphi %s1144_s17, %s1487_s17   ;;  %s1090_s16 = sphi %s1142_s16, %s1486_s16   ;;  %s1086_s15 = sphi %s1140_s15, %s1485_s15   ;;  %s1082_s14 = sphi %s1138_s14, %s1484_s14  }
   0x9   : > { %p41_p0 = scmp.ne.s32.totalorder %s1086_s15, %s1082_s14  ;;  %p1466_p1 = scmp.eq.s32.totalorder %s1159_s2, 0 }
   0xa   : > { %p113_p3 = scmp.eq.s32.totalorder %s832_s18, 1  ;;  %p833_p5 = scmp.ge.s32.totalorder %s1094_s17, 1 }
   0xb   : > { %p1168_p4 = por %p1466_p1, %p41_p0  ;;  %p120_p7 = scmp.lt.s32.totalorder %s1094_s17, 3 }
   0xc   : > { %p1173_p6 = por %p113_p3, %p41_p0  ;;  %s1096_s22 = smov [#allocation6]  }
   0xd   : > { %s1470_s19 = scalar_select %p1168_p4, 1, 0 }
   0xe   : > { %s1471_s20 = scalar_select %p1173_p6, 1, 0 }
   0xf   : > { %p1178_p8 = pnand %p833_p5, %p120_p7  ;;  %s132_s23 = sshll.u32 %s1096_s22, 4  ;;  %s133_s23 = int_to_ptr.vmem [resolvable:$true] %s132_s23 }
  0x10   : > { %s1192_s25 = sadd.s32 1, %s1094_s17   ;;  %s28_s26 = sadd.s32 1, %s1090_s16 }
  0x11   : > { %s1472_s21 = scalar_select %p1178_p8, 1, 0 }
  0x12   : > { %p893_p9 = pneg %p1178_p8  ;;  %s25_s27 = ssub.s32 %s1094_s17, %s1192_s25 }
  0x13   : > { %s983_s28 = scalar_lea.vmem %s133_s23, 512  ;;  %p991_p5 = scmp.lt.s32.totalorder %s133_s23, %s133_s23 }
  0x14   : > { %p1187_p11 = pnand %p893_p9, %p1466_p1  ;;  %p984_p13 = scmp.ne.s32.totalorder %s133_s23, %s983_s28 }
  0x15   : > { %p992_p7 = scmp.lt.s32.totalorder %s983_s28, %s983_s28 }
  0x16   : > { %p974_p12 = pneg %p1187_p11 }
  0x17   : > { %p993_p10 = por %p992_p7, %p991_p5 }
  0x18   : > { %p986_p0 = pnand %p984_p13, %p974_p12 }
  0x1a   : > { %p987_p3 = pneg %p986_p0 }
  0x1c   : > { %p994_p2 = pnand %p993_p10, %p987_p3 }
  0x1e   : > { %997 = shalt.err (!%p994_p2)
}
  0x1f   : > { %s1097_s29 = smov 128   ;;  %s1098_s30 = smov 8  }
  0x20   : > { %896 = dma.hbm_to_vmem [thread:$0]  (!%p1187_p11), %s1463_s1, 512, %s133_s23, [#allocation7], %s1097_s29, %s1097_s29, %s1098_s30  }
  0x21   : > { %p26_p9 = scmp.eq.s32.totalorder %s25_s27, 0  ;;  %p35_p12 = scmp.ne.s32.totalorder %s1090_s16, %s1086_s15 }
  0x22   : > { %p36_p10 = scmp.eq.s32.totalorder %s1094_s17, 0  ;;  %p906_p2 = scmp.lt.s32.totalorder %s1094_s17, 2 }
  0x23   : > { %s1209_s6 = scalar_select %p26_p9, %s1090_s16, %s28_s26  }
  0x24   : > { %p37_p13 = por %p36_p10, %p35_p12  ;;  %p1474_p0 = scmp.eq.s32.totalorder %s1159_s2, 1 }
  0x25   : > { %s149_s8 = sand.u32 1, %s1090_s16   ;;  %s868_s9 = sshll.u32 %s1094_s17, 9 }
  0x26   : > { %p1213_p3 = por %p1474_p0, %p35_p12  ;;  %s836_s10 = sshll.u32 %s149_s8, 5 }
  0x27   : > { %s1222_s13 = scalar_lea.hbm %s1462_s0, %s868_s9  ;;  %s153_s18 = scalar_lea.vmem [#allocation3], %s836_s10 }
  0x28   : > { %s1475_s7 = scalar_select %p1213_p3, 1, 0 }
  0x29   : > { %s160_s22 = sshll.u32 %s153_s18, 4  ;;  %p1224_p11 = pnand %p906_p2, %p37_p13  ;;  %s1228_s22 = int_to_ptr.vmem [resolvable:$true] %s160_s22 }
  0x2a   : > { %s1230_s24 = scalar_lea.sflag [#allocation4], %s149_s8  ;;  %s998_s26 = scalar_lea.hbm %s1222_s13, 512 }
  0x2b   : > { %p999_p5 = scmp.ne.s32.totalorder %s1222_s13, %s998_s26  ;;  %p1000_p7 = pneg %p1224_p11 }
  0x2c   : > { %s1003_s29 = scalar_lea.hbm %s1462_s0, 1024  ;;  %p1004_p10 = scmp.lt.s32.totalorder %s1222_s13, %s1462_s0 }
  0x2d   : > { %p1001_p9 = pnand %p1000_p7, %p999_p5  ;;  %p1005_p2 = scmp.lt.s32.totalorder %s1003_s29, %s998_s26 }
  0x2f   : > { %p1002_p12 = pneg %p1001_p9  ;;  %p1006_p13 = por %p1005_p2, %p1004_p10 }
  0x31   : > { %p1007_p0 = pnand %p1006_p13, %p1002_p12 }
  0x33   : > { %1010 = shalt.err (!%p1007_p0)
}
  0x34   : > { %s1011_s5 = scalar_lea.vmem %s1228_s22, 512  ;;  %s1099_s8 = smov [#allocation3]  }
  0x35   : > { %p1012_p1 = scmp.ne.s32.totalorder %s1228_s22, %s1011_s5  ;;  %s1016_s9 = sshll.u32 %s1099_s8, 4  ;;  %s1017_s9 = int_to_ptr.vmem [resolvable:$false] %s1016_s9 }
  0x36   : > { %s1018_s10 = scalar_lea.vmem %s1017_s9, 1024  ;;  %p1019_p9 = scmp.lt.s32.totalorder %s1228_s22, %s1017_s9 }
  0x37   : > { %p1014_p6 = pnand %p1012_p1, %p1000_p7  ;;  %p1020_p3 = scmp.lt.s32.totalorder %s1018_s10, %s1011_s5 }
  0x39   : > { %p1015_p5 = pneg %p1014_p6  ;;  %p1021_p4 = por %p1020_p3, %p1019_p9 }
  0x3b   : > { %p1022_p8 = pnand %p1021_p4, %p1015_p5 }
  0x3d   : > { %1025 = shalt.err (!%p1022_p8)
}
  0x3e   : > { %s1100_s11 = smov 256   ;;  %s1101_s12 = smov 16  }
  0x3f   : > { %900 = dma.hbm_to_vmem [thread:$0]  (!%p1224_p11), %s1222_s13, 512, %s1228_s22, %s1230_s24, %s1100_s11, %s1100_s11, %s1101_s12  }
  0x40   : > { %p1477_p1 = scmp.ne.s32.totalorder %s1472_s21, 0 }
  0x41   : > { %s1254_s18 = sand.u32 (!%p1477_p1), 1, %s1086_s15   ;;  %p1478_p4 = scmp.ne.s32.totalorder (!%p1477_p1), %s1470_s19, 0 }
  0x42   : > { %172 = sbr.rel (%p1477_p1) target bundleno = 817 (0x331), region = 32  ;;  %s840_s26 = sshll.u32 (!%p1477_p1), %s1254_s18, 5 }
  0x43   : > { %s175_s27 = scalar_lea.sflag (!%p1477_p1), [#allocation4], %s1254_s18  ;;  %s178_s28 = scalar_lea.vmem (!%p1477_p1), [#allocation3], %s840_s26 }
  0x47   : > { %1069 = dma.done.wait (%p1478_p4), %s175_s27, 512  }
  0x48   : > { %1071 = vsyncadd (%p1478_p4), %s175_s27, 4294966784  ;;  %p1479_p6 = scmp.eq.s32.totalorder %s1159_s2, 0 }
  0x4a   : > { %1073 = dma.done.wait (%p1479_p6), [#allocation7], 512   ;;  %p1480_p8 = pmov %p1479_p6 }
  0x4b   : > { %v1266_v0 = vld [vmem:[%s178_s28 + $0x4] ss:$16 sps:$4 sm:$0xff]   ;;  %v1268_v1 = vld [vmem:[%s178_s28] ss:$16 sps:$4 sm:$0xff]   ;;  %s1102_s21 = smov 91   ;;  %v1103_v3 = vmov 0  }
  0x4c   : > { %1075 = vsyncadd (%p1480_p8), [#allocation7], 4294966784  ;;  %321 = vrot.lane.b32.xlu0 %v1266_v0, %s1102_s21  ;;  %v1271_v2 = vld [vmem:[%s178_s28 + $0x8] ss:$16 sps:$4 sm:$0xff]   ;;  %431 = vmatprep.subr.bf16.mxu1 %v1103_v3  ;;  %s1104_s19 = smov 92   ;;  %s1105_s13 = smov 108  }
  0x4d   : > { %319 = vrot.lane.b32.xlu1 %v1268_v1, %s1102_s21  ;;  %v963_v4 = vld [vmem:[%s178_s28 + $0xc] ss:$16 sps:$4 sm:$0xff]   ;;  %s1106_s22 = smov 109   ;;  %s1107_s23 = smov 110   ;;  %vm371_vm0 = vcmask 130048   ;;  %vm327_vm1 = vcmask 744448  }
  0x4e   : > { %s1108_s24 = smov 126   ;;  %s1109_s29 = smov 127   ;;  %v966_v5 = vld [vmem:[#allocation6 + $0x4] ss:$8 sps:$4 sm:$0xff]   ;;  %vm312_vm2 = vcmask 752640   ;;  %vm297_vm3 = vcmask 883712  }
  0x4f   : > { %850 = vmatprep.mubr.msk.bf16.mxu0 %vm371_vm0, %v966_v5  ;;  %852 = vmatprep.mubr.msk.bf16.mxu1 %vm371_vm0, %v966_v5  ;;  %s1110_s30 = smov 90   ;;  %vm282_vm4 = vcmask 891904   ;;  %vm267_vm5 = vcmask 900096   ;;  %vm252_vm6 = vcmask 1031168   ;;  %vm237_vm7 = vcmask 1039360   ;;  %s649_s4 = sld [smem:[#allocation2]] }
  0x50   : > { %323 = vrot.lane.b32.xlu0 %v1271_v2, %s1102_s21  ;;  %vm342_vm8 = vcmask 736256   ;;  %v964_v60 = vld [vmem:[#allocation6] ss:$8 sps:$4 sm:$0xff]   ;;  %v967_v62 = vld [vmem:[#allocation6 + $0x14] ss:$8 sps:$4 sm:$0xff]   ;;  %s877_s5 = smul.u32 48, %s1254_s18 }
  0x51   : > { %306 = vrot.lane.b32.xlu1 %v1266_v0, %s1104_s19  ;;  %s884_s8 = smul.u32 768, %s1159_s2  ;;  %s736_s26 = scalar_lea.sflag [#allocation5], %s1254_s18 }
  0x52   : > { %s204_s9 = scalar_lea.vmem [#allocation8], %s877_s5  ;;  %p1481_p11 = scmp.ne.s32.totalorder %s1475_s7, 0 }
  0x53   : > { %s749_s10 = sshll.u32 %s204_s9, 4  ;;  %s1417_s12 = scalar_lea.hbm %s1465_s3, %s884_s8  ;;  %s1419_s10 = int_to_ptr.vmem [resolvable:$true] %s749_s10 }
  0x54   : > { %308 = vrot.lane.b32.xlu0 %v1271_v2, %s1104_s19  ;;  %s1026_s27 = scalar_lea.vmem %s1419_s10, 768  ;;  %s1112_s28 = smov [#allocation8]  }
  0x55   : > { %304 = vrot.lane.b32.xlu1 %v1268_v1, %s1104_s19  ;;  %p1027_p3 = scmp.ne.s32.totalorder %s1419_s10, %s1026_s27 }
  0x57   : > { %p1028_p7 = pnand %p1027_p3, %p1481_p11 }
  0x58   : > { %325 = vrot.lane.b32.xlu0 %v963_v4, %s1102_s21  ;;  %s1030_s21 = sshll.u32 %s1112_s28, 4  ;;  %s1031_s21 = int_to_ptr.vmem [resolvable:$false] %s1030_s21 }
  0x59   : > { %291 = vrot.lane.b32.xlu1 %v1266_v0, %s1105_s13  ;;  %p1029_p12 = pneg %p1028_p7  ;;  %p1033_p10 = scmp.lt.s32.totalorder %s1419_s10, %s1031_s21 }
  0x5c   : > { %293 = vrot.lane.b32.xlu0 %v1271_v2, %s1105_s13 }
  0x5d   : > { %289 = vrot.lane.b32.xlu1 %v1268_v1, %s1105_s13 }
  0x60   : > { %310 = vrot.lane.b32.xlu0 %v963_v4, %s1104_s19  ;;  %s1032_s19 = scalar_lea.vmem %s1031_s21, 1536 }
  0x61   : > { %276 = vrot.lane.b32.xlu1 %v1266_v0, %s1106_s22  ;;  %p1034_p2 = scmp.lt.s32.totalorder %s1032_s19, %s1026_s27 }
  0x63   : > { %p1035_p13 = por %p1034_p2, %p1033_p10 }
  0x64   : > { %278 = vrot.lane.b32.xlu0 %v1271_v2, %s1106_s22 }
  0x65   : > { %274 = vrot.lane.b32.xlu1 %v1268_v1, %s1106_s22  ;;  %p1036_p0 = pnand %p1035_p13, %p1029_p12 }
  0x68   : > { %295 = vrot.lane.b32.xlu0 %v963_v4, %s1105_s13 }
  0x69   : > { %261 = vrot.lane.b32.xlu1 %v1266_v0, %s1107_s23 }
  0x6c   : > { %263 = vrot.lane.b32.xlu0 %v1271_v2, %s1107_s23 }
  0x6d   : > { %259 = vrot.lane.b32.xlu1 %v1268_v1, %s1107_s23 }
  0x70   : > { %280 = vrot.lane.b32.xlu0 %v963_v4, %s1106_s22 }
  0x71   : > { %246 = vrot.lane.b32.xlu1 %v1266_v0, %s1108_s24 }
  0x74   : > { %248 = vrot.lane.b32.xlu0 %v1271_v2, %s1108_s24 }
  0x75   : > { %244 = vrot.lane.b32.xlu1 %v1268_v1, %s1108_s24 }
  0x78   : > { %265 = vrot.lane.b32.xlu0 %v963_v4, %s1107_s23 }
  0x79   : > { %231 = vrot.lane.b32.xlu1 %v1266_v0, %s1109_s29 }
  0x7c   : > { %233 = vrot.lane.b32.xlu0 %v1271_v2, %s1109_s29 }
  0x7d   : > { %229 = vrot.lane.b32.xlu1 %v1268_v1, %s1109_s29 }
  0x80   : > { %250 = vrot.lane.b32.xlu0 %v963_v4, %s1108_s24 }
  0x81   : > { %235 = vrot.lane.b32.xlu1 %v963_v4, %s1109_s29 }
  0x84   : > { %336 = vrot.lane.b32.xlu0 %v1266_v0, %s1110_s30 }
  0x85   : > { %338 = vrot.lane.b32.xlu1 %v1271_v2, %s1110_s30 }
  0x88   : > { %334 = vrot.lane.b32.xlu0 %v1268_v1, %s1110_s30 }
  0x89   : > { %340 = vrot.lane.b32.xlu1 %v963_v4, %s1110_s30 }
  0xbe   : > { %v322_v6 = vpop.permute.xlu0 %321 }
  0xbf   : > { %v320_v7 = vpop.permute.xlu1 %319 }
  0xc0   : > { %v328_v11 = vsel %vm327_vm1, %v320_v7, %v322_v6 }
  0xc2   : > { %v324_v8 = vpop.permute.xlu0 %323 }
  0xc3   : > { %v307_v9 = vpop.permute.xlu1 %306  ;;  %v329_v10 = vsel %vm327_vm1, %v322_v6, %v324_v8 }
  0xc4   : > { %378 = vmatprep.subr.bf16.mxu0 %v329_v10 }
  0xc5   : > { %379 = vmatpush1.bf16.msra.mxu0 %v328_v11 }
  0xc6   : > { %v309_v12 = vpop.permute.xlu0 %308 }
  0xc7   : > { %v305_v13 = vpop.permute.xlu1 %304  ;;  %v314_v14 = vsel %vm312_vm2, %v307_v9, %v309_v12 }
  0xc8   : > { %380 = vmatprep.subr.bf16.mxu0 %v314_v14  ;;  %v313_v15 = vsel %vm312_vm2, %v305_v13, %v307_v9 }
  0xc9   : > { %381 = vmatpush1.bf16.msra.mxu0 %v313_v15 }
  0xca   : > { %v326_v16 = vpop.permute.xlu0 %325 }
  0xcb   : > { %v292_v17 = vpop.permute.xlu1 %291  ;;  %v330_v18 = vsel %vm327_vm1, %v324_v8, %v326_v16 }
  0xcc   : > { %432 = vmatpush1.bf16.msra.mxu1 %v330_v18 }
  0xcd   : > { %433 = vmatprep.subr.bf16.mxu1 %v1103_v3 }
  0xce   : > { %v294_v19 = vpop.permute.xlu0 %293 }
  0xcf   : > { %v290_v20 = vpop.permute.xlu1 %289  ;;  %v299_v21 = vsel %vm297_vm3, %v292_v17, %v294_v19 }
  0xd0   : > { %382 = vmatprep.subr.bf16.mxu0 %v299_v21  ;;  %v298_v22 = vsel %vm297_vm3, %v290_v20, %v292_v17 }
  0xd1   : > { %383 = vmatpush1.bf16.msra.mxu0 %v298_v22 }
  0xd2   : > { %v311_v23 = vpop.permute.xlu0 %310 }
  0xd3   : > { %v277_v24 = vpop.permute.xlu1 %276  ;;  %v315_v25 = vsel %vm312_vm2, %v309_v12, %v311_v23 }
  0xd4   : > { %434 = vmatpush1.bf16.msra.mxu1 %v315_v25 }
  0xd5   : > { %435 = vmatprep.subr.bf16.mxu1 %v1103_v3 }
  0xd6   : > { %v279_v26 = vpop.permute.xlu0 %278 }
  0xd7   : > { %v275_v27 = vpop.permute.xlu1 %274  ;;  %v284_v28 = vsel %vm282_vm4, %v277_v24, %v279_v26 }
  0xd8   : > { %384 = vmatprep.subr.bf16.mxu0 %v284_v28  ;;  %v283_v29 = vsel %vm282_vm4, %v275_v27, %v277_v24  ;;  %v1111_v27 = vmov 0.0  }
  0xd9   : > { %385 = vmatpush1.bf16.msra.mxu0 %v283_v29 }
  0xda   : > { %v296_v30 = vpop.permute.xlu0 %295 }
  0xdb   : > { %v262_v31 = vpop.permute.xlu1 %261  ;;  %v300_v32 = vsel %vm297_vm3, %v294_v19, %v296_v30 }
  0xdc   : > { %436 = vmatpush1.bf16.msra.mxu1 %v300_v32 }
  0xdd   : > { %437 = vmatprep.subr.bf16.mxu1 %v1103_v3 }
  0xde   : > { %v264_v33 = vpop.permute.xlu0 %263 }
  0xdf   : > { %v260_v34 = vpop.permute.xlu1 %259  ;;  %v269_v35 = vsel %vm267_vm5, %v262_v31, %v264_v33 }
  0xe0   : > { %386 = vmatprep.subr.bf16.mxu0 %v269_v35  ;;  %v268_v36 = vsel %vm267_vm5, %v260_v34, %v262_v31 }
  0xe1   : > { %387 = vmatpush1.bf16.msra.mxu0 %v268_v36 }
  0xe2   : > { %v281_v37 = vpop.permute.xlu0 %280 }
  0xe3   : > { %v247_v38 = vpop.permute.xlu1 %246  ;;  %v285_v39 = vsel %vm282_vm4, %v279_v26, %v281_v37 }
  0xe4   : > { %438 = vmatpush1.bf16.msra.mxu1 %v285_v39 }
  0xe5   : > { %439 = vmatprep.subr.bf16.mxu1 %v1103_v3 }
  0xe6   : > { %v249_v40 = vpop.permute.xlu0 %248 }
  0xe7   : > { %v245_v41 = vpop.permute.xlu1 %244  ;;  %v254_v42 = vsel %vm252_vm6, %v247_v38, %v249_v40 }
  0xe8   : > { %388 = vmatprep.subr.bf16.mxu0 %v254_v42  ;;  %v253_v43 = vsel %vm252_vm6, %v245_v41, %v247_v38 }
  0xe9   : > { %389 = vmatpush1.bf16.msra.mxu0 %v253_v43 }
  0xea   : > { %v266_v44 = vpop.permute.xlu0 %265 }
  0xeb   : > { %v232_v45 = vpop.permute.xlu1 %231  ;;  %v270_v46 = vsel %vm267_vm5, %v264_v33, %v266_v44 }
  0xec   : > { %440 = vmatpush1.bf16.msra.mxu1 %v270_v46 }
  0xed   : > { %441 = vmatprep.subr.bf16.mxu1 %v1103_v3 }
  0xee   : > { %v234_v47 = vpop.permute.xlu0 %233 }
  0xef   : > { %v230_v48 = vpop.permute.xlu1 %229  ;;  %v239_v49 = vsel %vm237_vm7, %v232_v45, %v234_v47 }
  0xf0   : > { %390 = vmatprep.subr.bf16.mxu0 %v239_v49  ;;  %v238_v50 = vsel %vm237_vm7, %v230_v48, %v232_v45 }
  0xf1   : > { %391 = vmatpush1.bf16.msra.mxu0 %v238_v50 }
  0xf2   : > { %v251_v51 = vpop.permute.xlu0 %250  ;;  %392 = vmatprep.subr.bf16.mxu0 %v1266_v0  ;;  %v969_v0 = vld [vmem:[#allocation6 + $0x10] ss:$8 sps:$4 sm:$0xff]  }
  0xf3   : > { %v236_v52 = vpop.permute.xlu1 %235  ;;  %v255_v53 = vsel %vm252_vm6, %v249_v40, %v251_v51 }
  0xf4   : > { %442 = vmatpush1.bf16.msra.mxu1 %v255_v53  ;;  %v240_v56 = vsel %vm237_vm7, %v234_v47, %v236_v52 }
  0xf5   : > { %393 = vmatpush1.bf16.msra.mxu0 %v1268_v1  ;;  %443 = vmatprep.subr.bf16.mxu1 %v1103_v3  ;;  %v480_v1 = vlaneseq }
  0xf6   : > { %v337_v54 = vpop.permute.xlu0 %336 }
  0xf7   : > { %v339_v55 = vpop.permute.xlu1 %338  ;;  %v481_v4 = vand.u32 127, %v480_v1 }
  0xf8   : > { %v344_v57 = vsel %vm342_vm8, %v337_v54, %v339_v55  ;;  %444 = vmatpush1.bf16.msra.mxu1 %v240_v56 }
  0xf9   : > { %408 = vmatprep.subr.bf16.mxu0 %v344_v57  ;;  %445 = vmatprep.subr.bf16.mxu1 %v1103_v3  ;;  %v483_v5 = vadd.s32 256, %v481_v4  ;;  %v482_v6 = vadd.s32 128, %v481_v4 }
  0xfa   : > { %v335_v58 = vpop.permute.xlu0 %334 }
  0xfb   : > { %v343_v59 = vsel %vm342_vm8, %v335_v58, %v337_v54  ;;  %v341_v61 = vpop.permute.xlu1 %340  ;;  %v1342_v9 = vmul.u32.u64.low 3817748708, %v482_v6  ;;  %v1343_v10 = vmul.u32.u64.high 3817748708, %v482_v6, %v1342_v9  ;;  %vm537_vm3 = vcmp.lt.s32.totalorder %v483_v5, 288 }
  0xfc   : > { %409 = vmatpush2.bf16.msra.mxu0 %v343_v59  ;;  %446 = vmatpush1.bf16.msra.mxu1 %v1271_v2  ;;  %v345_v63 = vsel %vm342_vm8, %v339_v55, %v341_v61  ;;  %v1336_v2 = vmul.u32.u64.low 3817748708, %v481_v4  ;;  %v1337_v7 = vmul.u32.u64.high 3817748708, %v481_v4, %v1336_v2 }
  0xfd   : > { %461 = vmatprep.subr.bf16.mxu1 %v1103_v3  ;;  %v1339_v3 = vmul.u32.u64.low 3817748708, %v483_v5  ;;  %v1340_v8 = vmul.u32.u64.high 3817748708, %v483_v5, %v1339_v3  ;;  %v501_v13 = vshrl.u32 %v1343_v10, 4 }
  0xfe   : > { %v490_v11 = vshrl.u32 %v1337_v7, 4 }
  0xff   : > { %411 = vmatmul.mubr.bf16.vlgmr.msra.gmra.mxu0 %v964_v60  ;;  %v512_v12 = vshrl.u32 %v1340_v8, 4  ;;  %v502_v16 = vmul.u32 18, %v501_v13 }
 0x100   : > { %462 = vmatpush2.bf16.msra.mxu1 %v345_v63  ;;  %851 = vmatprep.mubr.msk.bf16.mxu0 %vm371_vm0, %v967_v62  ;;  %v491_v14 = vmul.u32 18, %v490_v11 }
 0x101   : > { %v513_v15 = vmul.u32 18, %v512_v12  ;;  %v503_v19 = vsub.s32 %v482_v6, %v502_v16 }
 0x102   : > { %v492_v17 = vsub.s32 %v481_v4, %v491_v14 }
 0x103   : > { %464 = vmatmul.mubr.bf16.vlgmr.msra.gmra.mxu1 %v964_v60  ;;  %v514_v18 = vsub.s32 %v483_v5, %v513_v15  ;;  %vm518_vm13 = vcmp.ne.s32.totalorder %v503_v19, 0  ;;  %vm521_vm14 = vcmp.lt.s32.totalorder %v503_v19, 0  ;;  %v527_v22 = vadd.s32 18, %v503_v19 }
 0x104   : > { %853 = vmatprep.mubr.msk.bf16.mxu1 %vm371_vm0, %v967_v62  ;;  %vm517_vm9 = vcmp.ne.s32.totalorder %v492_v17, 0  ;;  %vm520_vm10 = vcmp.lt.s32.totalorder %v492_v17, 0  ;;  %v526_v21 = vadd.s32 18, %v492_v17  ;;  %vm524_vm1 = vmand %vm521_vm14, %vm518_vm13 }
 0x105   : > { %vm519_vm11 = vcmp.ne.s32.totalorder %v514_v18, 0  ;;  %vm522_vm12 = vcmp.lt.s32.totalorder %v514_v18, 0  ;;  %vm523_vm15 = vmand %vm520_vm10, %vm517_vm9  ;;  %v528_v20 = vadd.s32 18, %v514_v18  ;;  %v530_v25 = vsel %vm524_vm1, %v527_v22, %v503_v19 }
 0x106   : > { %vm525_vm0 = vmand %vm522_vm12, %vm519_vm11  ;;  %v529_v24 = vsel %vm523_vm15, %v526_v21, %v492_v17  ;;  %vm533_vm5 = vcmp.lt.s32.totalorder %v530_v25, 16 }
 0x107   : > { %421 = vmatmul.mubr.bf16.gmra.mxu0 %v969_v0  ;;  %v531_v23 = vsel %vm525_vm0, %v528_v20, %v514_v18  ;;  %vm532_vm4 = vcmp.lt.s32.totalorder %v529_v24, 16  ;;  %v1350_v29 = vsel %vm533_vm5, 1.0, %v1111_v27 }
 0x108   : > { %vm534_vm2 = vcmp.lt.s32.totalorder %v531_v23, 16  ;;  %v1348_v28 = vsel %vm532_vm4, 1.0, %v1111_v27 }
 0x109   : > { %vm540_vm6 = vmand %vm534_vm2, %vm537_vm3 }
 0x10a   : > { %v1352_v31 = vsel %vm540_vm6, 1.0, %v1111_v27 }
 0x10b   : > { %472 = vmatmul.mubr.bf16.gmra.mxu1 %v969_v0 }
 0x1bf   : > { %v412_v26 = vpop.f32.mrf.mxu0 }
 0x1c0   : > { %v547_v32 = vmul.f32 %v1348_v28, %v412_v26 }
 0x1c1   : > { %v414_v30 = vpop.f32.mrf.mxu0 }
 0x1c2   : > { %v548_v33 = vmul.f32 %v1350_v29, %v414_v30 }
 0x1c3   : > { %v416_v34 = vpop.f32.mrf.mxu0  ;;  %v465_v35 = vpop.f32.mrf.mxu1 }
 0x1c4   : > { %v549_v36 = vmul.f32 %v1352_v31, %v465_v35  ;;  %v559_v37 = vadd.f32 %v548_v33, %v547_v32  ;;  %v550_v40 = vmul.f32 %v1348_v28, %v416_v34 }
 0x1c5   : > { %v418_v38 = vpop.f32.mrf.mxu0  ;;  %v467_v39 = vpop.f32.mrf.mxu1 }
 0x1c6   : > { %v551_v41 = vmul.f32 %v1350_v29, %v418_v38  ;;  %v560_v42 = vadd.f32 %v559_v37, %v549_v36 }
 0x1c7   : > { %v422_v43 = vpop.f32.mrf.mxu0  ;;  %v468_v44 = vpop.f32.mrf.mxu1 }
 0x1c8   : > { %v552_v45 = vmul.f32 %v1352_v31, %v468_v44  ;;  %561 = vadd.xlane.f32.xlu0 %v560_v42  ;;  %v563_v46 = vadd.f32 %v551_v41, %v550_v40  ;;  %v553_v49 = vmul.f32 %v1348_v28, %v422_v43 }
 0x1c9   : > { %v424_v47 = vpop.f32.mrf.mxu0  ;;  %v470_v48 = vpop.f32.mrf.mxu1 }
 0x1ca   : > { %v554_v50 = vmul.f32 %v1350_v29, %v424_v47  ;;  %v564_v51 = vadd.f32 %v563_v46, %v552_v45 }
 0x1cb   : > { %v426_v52 = vpop.f32.mrf.mxu0  ;;  %v473_v53 = vpop.f32.mrf.mxu1 }
 0x1cc   : > { %v555_v54 = vmul.f32 %v1352_v31, %v473_v53  ;;  %565 = vadd.xlane.f32.xlu1 %v564_v51  ;;  %v567_v55 = vadd.f32 %v554_v50, %v553_v49  ;;  %v556_v58 = vmul.f32 %v1348_v28, %v426_v52 }
 0x1cd   : > { %v428_v56 = vpop.f32.mrf.mxu0  ;;  %v475_v57 = vpop.f32.mrf.mxu1 }
 0x1ce   : > { %v557_v59 = vmul.f32 %v1350_v29, %v428_v56  ;;  %v568_v60 = vadd.f32 %v567_v55, %v555_v54 }
 0x1cf   : > { %v476_v61 = vpop.f32.mrf.mxu1 }
 0x1d0   : > { %v571_v62 = vadd.f32 %v557_v59, %v556_v58  ;;  %v558_v63 = vmul.f32 %v1352_v31, %v476_v61  ;;  %569 = vadd.xlane.f32.xlu0 %v568_v60 }
 0x1d1   : > { %v478_v0 = vpop.f32.mrf.mxu1 }
 0x1d2   : > { %v572_v1 = vadd.f32 %v571_v62, %v558_v63  ;;  %v662_v0 = vstv %s649_s4 }
 0x1d4   : > { %573 = vadd.xlane.f32.xlu0 %v572_v1 }
 0x251   : > { %v562_v4 = vpop.xlane.xlu0 %561 }
 0x255   : > { %v566_v5 = vpop.xlane.xlu1 %565 }
 0x256   : > { %v575_v2 = vadd.f32 %v566_v5, %v562_v4 }
 0x259   : > { %v570_v6 = vpop.xlane.xlu0 %569 }
 0x25a   : > { %v576_v7 = vadd.f32 %v575_v2, %v570_v6 }
 0x25d   : > { %v574_v3 = vpop.xlane.xlu0 %573 }
 0x25e   : > { %v577_v8 = vadd.f32 %v576_v7, %v574_v3 }
 0x260   : > { %v578_v9 = vmul.f32 0.0009765625, %v577_v8 }
 0x262   : > { %v1366_v10 = vsub.f32 %v416_v34, %v578_v9  ;;  %v1368_v11 = vsub.f32 %v418_v38, %v578_v9  ;;  %v1370_v12 = vsub.f32 %v468_v44, %v578_v9  ;;  %v579_v13 = vsub.f32 %v412_v26, %v578_v9 }
 0x263   : > { %v580_v14 = vsub.f32 %v414_v30, %v578_v9  ;;  %v581_v15 = vsub.f32 %v465_v35, %v578_v9  ;;  %v1372_v16 = vsub.f32 %v426_v52, %v578_v9  ;;  %v1374_v17 = vsub.f32 %v428_v56, %v578_v9 }
 0x264   : > { %v594_v18 = vmul.f32 %v1348_v28, %v1366_v10  ;;  %v595_v19 = vmul.f32 %v1350_v29, %v1368_v11  ;;  %v596_v20 = vmul.f32 %v1352_v31, %v1370_v12  ;;  %v591_v21 = vmul.f32 %v1348_v28, %v579_v13 }
 0x265   : > { %v592_v22 = vmul.f32 %v1350_v29, %v580_v14  ;;  %v593_v23 = vmul.f32 %v1352_v31, %v581_v15  ;;  %v590_v24 = vsub.f32 %v476_v61, %v578_v9  ;;  %v600_v25 = vmul.f32 %v1348_v28, %v1372_v16 }
 0x266   : > { %v606_v26 = vmul.f32 %v594_v18, %v594_v18  ;;  %v607_v27 = vmul.f32 %v595_v19, %v595_v19  ;;  %v603_v30 = vmul.f32 %v591_v21, %v591_v21  ;;  %v608_v32 = vmul.f32 %v596_v20, %v596_v20 }
 0x267   : > { %v604_v33 = vmul.f32 %v592_v22, %v592_v22  ;;  %v601_v34 = vmul.f32 %v1350_v29, %v1374_v17  ;;  %v602_v35 = vmul.f32 %v1352_v31, %v590_v24  ;;  %v612_v37 = vmul.f32 %v600_v25, %v600_v25 }
 0x268   : > { %v619_v36 = vadd.f32 %v607_v27, %v606_v26  ;;  %v585_v38 = vsub.f32 %v422_v43, %v578_v9  ;;  %v586_v39 = vsub.f32 %v424_v47, %v578_v9  ;;  %v605_v40 = vmul.f32 %v593_v23, %v593_v23 }
 0x269   : > { %v615_v41 = vadd.f32 %v604_v33, %v603_v30  ;;  %v613_v42 = vmul.f32 %v601_v34, %v601_v34  ;;  %v587_v44 = vsub.f32 %v473_v53, %v578_v9  ;;  %v614_v52 = vmul.f32 %v602_v35, %v602_v35 }
 0x26a   : > { %v620_v45 = vadd.f32 %v619_v36, %v608_v32  ;;  %v597_v46 = vmul.f32 %v1348_v28, %v585_v38  ;;  %v598_v48 = vmul.f32 %v1350_v29, %v586_v39 }
 0x26b   : > { %v616_v49 = vadd.f32 %v615_v41, %v605_v40  ;;  %v627_v50 = vadd.f32 %v613_v42, %v612_v37  ;;  %v599_v51 = vmul.f32 %v1352_v31, %v587_v44 }
 0x26c   : > { %621 = vadd.xlane.f32.xlu0 %v620_v45  ;;  %v609_v54 = vmul.f32 %v597_v46, %v597_v46  ;;  %v610_v55 = vmul.f32 %v598_v48, %v598_v48 }
 0x26d   : > { %617 = vadd.xlane.f32.xlu1 %v616_v49  ;;  %v628_v43 = vadd.f32 %v627_v50, %v614_v52  ;;  %v611_v47 = vmul.f32 %v599_v51, %v599_v51 }
 0x26e   : > { %v623_v56 = vadd.f32 %v610_v55, %v609_v54 }
 0x270   : > { %629 = vadd.xlane.f32.xlu0 %v628_v43  ;;  %v624_v57 = vadd.f32 %v623_v56, %v611_v47 }
 0x272   : > { %625 = vadd.xlane.f32.xlu1 %v624_v57 }
 0x2f5   : > { %v622_v58 = vpop.xlane.xlu0 %621 }
 0x2f6   : > { %v618_v53 = vpop.xlane.xlu1 %617 }
 0x2f7   : > { %v631_v28 = vadd.f32 %v622_v58, %v618_v53 }
 0x2f9   : > { %v630_v60 = vpop.xlane.xlu0 %629 }
 0x2fb   : > { %v626_v59 = vpop.xlane.xlu1 %625 }
 0x2fc   : > { %v632_v29 = vadd.f32 %v631_v28, %v626_v59 }
 0x2fe   : > { %v633_v61 = vadd.f32 %v632_v29, %v630_v60 }
 0x300   : > { %v634_v31 = vmul.f32 0.0009765625, %v633_v61 }
 0x302   : > { %v635_v62 = vadd.f32 1e-05, %v634_v31 }
 0x304   : > { %970 = vrsqrt.f32 %v635_v62 }
 0x311   : > { %v971_v63 = vpop.eup %970 }
 0x312   : > { %v637_v1 = vmul.f32 %v971_v63, %v579_v13  ;;  %v638_v4 = vmul.f32 %v971_v63, %v580_v14  ;;  %v639_v5 = vmul.f32 %v971_v63, %v581_v15  ;;  %v640_v6 = vmul.f32 %v971_v63, %v1366_v10 }
 0x313   : > { %v641_v2 = vmul.f32 %v971_v63, %v1368_v11  ;;  %v642_v7 = vmul.f32 %v971_v63, %v1370_v12  ;;  %v643_v3 = vmul.f32 %v971_v63, %v585_v38  ;;  %v644_v8 = vmul.f32 %v971_v63, %v586_v39 }
 0x314   : > { %v645_v9 = vmul.f32 %v971_v63, %v587_v44  ;;  %v646_v18 = vmul.f32 %v971_v63, %v1372_v16  ;;  %v647_v19 = vmul.f32 %v971_v63, %v1374_v17  ;;  %v648_v20 = vmul.f32 %v971_v63, %v590_v24 }
 0x315   : > { %vm650_vm7 = vcmp.ge.f32.partialorder %v637_v1, 0.0  ;;  %vm651_vm8 = vcmp.ge.f32.partialorder %v638_v4, 0.0  ;;  %vm652_vm9 = vcmp.ge.f32.partialorder %v639_v5, 0.0  ;;  %vm653_vm10 = vcmp.ge.f32.partialorder %v640_v6, 0.0 }
 0x316   : > { %vm654_vm11 = vcmp.ge.f32.partialorder %v641_v2, 0.0  ;;  %vm655_vm12 = vcmp.ge.f32.partialorder %v642_v7, 0.0  ;;  %vm656_vm13 = vcmp.ge.f32.partialorder %v643_v3, 0.0  ;;  %vm657_vm14 = vcmp.ge.f32.partialorder %v644_v8, 0.0 }
 0x317   : > { %vm658_vm15 = vcmp.ge.f32.partialorder %v645_v9, 0.0  ;;  %vm659_vm0 = vcmp.ge.f32.partialorder %v646_v18, 0.0  ;;  %vm660_vm1 = vcmp.ge.f32.partialorder %v647_v19, 0.0  ;;  %vm661_vm2 = vcmp.ge.f32.partialorder %v648_v20, 0.0 }
 0x318   : > { %v663_v10 = vmul.f32 %v662_v0, %v637_v1  ;;  %v664_v11 = vmul.f32 %v662_v0, %v638_v4  ;;  %v665_v12 = vmul.f32 %v662_v0, %v639_v5  ;;  %v666_v13 = vmul.f32 %v662_v0, %v640_v6 }
 0x319   : > { %v667_v14 = vmul.f32 %v662_v0, %v641_v2  ;;  %v668_v15 = vmul.f32 %v662_v0, %v642_v7  ;;  %v669_v16 = vmul.f32 %v662_v0, %v643_v3  ;;  %v670_v17 = vmul.f32 %v662_v0, %v644_v8 }
 0x31a   : > { %v671_v21 = vmul.f32 %v662_v0, %v645_v9  ;;  %v672_v22 = vmul.f32 %v662_v0, %v646_v18  ;;  %v673_v23 = vmul.f32 %v662_v0, %v647_v19  ;;  %v674_v24 = vmul.f32 %v662_v0, %v648_v20 }
 0x31b   : > { %v675_v25 = vsel %vm650_vm7, %v637_v1, %v663_v10  ;;  %v676_v26 = vsel %vm651_vm8, %v638_v4, %v664_v11  ;;  %v677_v27 = vsel %vm652_vm9, %v639_v5, %v665_v12  ;;  %v678_v30 = vsel %vm653_vm10, %v640_v6, %v666_v13 }
 0x31c   : > { %v679_v32 = vsel %vm654_vm11, %v641_v2, %v667_v14  ;;  %v680_v33 = vsel %vm655_vm12, %v642_v7, %v668_v15  ;;  %v681_v34 = vsel %vm656_vm13, %v643_v3, %v669_v16  ;;  %v682_v35 = vsel %vm657_vm14, %v644_v8, %v670_v17 }
 0x31d   : > { %v683_v36 = vsel %vm658_vm15, %v645_v9, %v671_v21  ;;  %v684_v37 = vsel %vm659_vm0, %v646_v18, %v672_v22  ;;  %v685_v38 = vsel %vm660_vm1, %v647_v19, %v673_v23  ;;  %v686_v39 = vsel %vm661_vm2, %v648_v20, %v674_v24 }
 0x31e   : > { %v869_v40 = vpack.c.bf16 %v676_v26, %v675_v25  ;;  %v870_v41 = vpack.c.bf16 %v677_v27, %v677_v27  ;;  %v871_v42 = vpack.c.bf16 %v679_v32, %v678_v30  ;;  %v872_v44 = vpack.c.bf16 %v680_v33, %v680_v33 }
 0x31f   : > { %v873_v45 = vpack.c.bf16 %v682_v35, %v681_v34  ;;  %v874_v46 = vpack.c.bf16 %v683_v36, %v683_v36  ;;  %v875_v48 = vpack.c.bf16 %v685_v38, %v684_v37  ;;  %v876_v49 = vpack.c.bf16 %v686_v39, %v686_v39 }
 0x320   : > { %727 = vst [vmem:[%s204_s9] sm:$0xff] %v869_v40  ;;  %728 = vst [vmem:[%s204_s9 + $0x8] sm:$0xf] %v870_v41 }
 0x321   : > { %729 = vst [vmem:[%s204_s9 + $0xc] sm:$0xff] %v871_v42  ;;  %730 = vst [vmem:[%s204_s9 + $0x14] sm:$0xf] %v872_v44 }
 0x322   : > { %731 = vst [vmem:[%s204_s9 + $0x18] sm:$0xff] %v873_v45  ;;  %732 = vst [vmem:[%s204_s9 + $0x20] sm:$0xf] %v874_v46 }
 0x323   : > { %733 = vst [vmem:[%s204_s9 + $0x24] sm:$0xff] %v875_v48  ;;  %734 = vst [vmem:[%s204_s9 + $0x2c] sm:$0xf] %v876_v49 }
 0x324   : > { %1039 = shalt.err (!%p1036_p0)
}
 0x325   : > { %s1040_s13 = scalar_lea.hbm %s1417_s12, 768  ;;  %s1044_s24 = scalar_lea.hbm %s1465_s3, 1536 }
 0x326   : > { %p1041_p5 = scmp.ne.s32.totalorder %s1417_s12, %s1040_s13  ;;  %p1045_p4 = scmp.lt.s32.totalorder %s1417_s12, %s1465_s3 }
 0x327   : > { %p1046_p6 = scmp.lt.s32.totalorder %s1044_s24, %s1040_s13 }
 0x328   : > { %p1042_p9 = pnand %p1041_p5, %p1481_p11 }
 0x329   : > { %p1047_p8 = por %p1046_p6, %p1045_p4 }
 0x32a   : > { %p1043_p1 = pneg %p1042_p9 }
 0x32c   : > { %p1048_p3 = pnand %p1047_p8, %p1043_p1 }
 0x32e   : > { %1051 = shalt.err (!%p1048_p3)
}
 0x32f   : > { %s1113_s4 = smov 192   ;;  %s1114_s5 = smov 12  }
 0x330   : > { %891 = dma.vmem_to_hbm [thread:$0]  (%p1481_p11), %s1419_s10, 768, %s1417_s12, %s736_s26, %s1113_s4, %s1113_s4, %s1114_s5  }
 0x331 PF: > { %s764_s8 = sand.u32 1, %s1082_s14   ;;  %p1482_p7 = scmp.ne.s32.totalorder %s1471_s20, 0 }
 0x332   : > { %p1483_p12 = scmp.ge.s32.totalorder %s1094_s17, 2  ;;  %s765_s9 = scalar_lea.sflag [#allocation5], %s764_s8 }
 0x334   : > { %p902_p10 = pnand %p1483_p12, %p1482_p7 }
 0x336   : > { %p903_p2 = pneg %p902_p10 }
 0x338   : > { %1077 = dma.done.wait (%p903_p2), %s765_s9, 768  }
 0x339   : > { %1079 = vsyncadd (%p903_p2), %s765_s9, 4294966528  ;;  %p18_p13 = scmp.ge.s32.totalorder %s1192_s25, 4   ;;  %s1484_s14 = smov %s1086_s15 }
 0x33a   : > { %s1485_s15 = smov %s1090_s16  ;;  %s1486_s16 = smov %s1209_s6 }
 0x33b   : > { %s1487_s17 = smov %s1192_s25  ;;  %20 = sbr.rel (!%p18_p13) target bundleno = 8 (0x8), region = 81 }
 0x340   :  { %770 = vsyncpa [#allocation4], 1 }
 0x341   :  { %772 = vsyncpa [#allocation4 + $0x1], 1 }
 0x342   :  { %773 = vsyncpa [#allocation7], 1 }
 0x343   :  { %774 = vsyncpa [#allocation5], 1 }
 0x344   :  { %776 = vsyncpa [#allocation5 + $0x1], 1 }

</bundles_post_ra>
